<compile_context>
chip_gen: v6e
topology: v6e:2x2x1
jax: 0.10.0
libtpu: 0.0.40
codegen_flags: <defaults>
</compile_context>

<pallas_src>
import jax
import jax.numpy as jnp
from jax.experimental import pallas as pl
from jax.experimental.pallas import tpu as pltpu


# ----------------------------------------------------------------------------
# Kernel
# ----------------------------------------------------------------------------
def moef_kernel(sim_ref, com_ref, w_sim_ref, w_com_ref, b_ref, out_ref):
    # Packed result columns: [gate0, gate1, moe0, moe1, y1, y2, pad, pad]
    acc = (
        jnp.dot(sim_ref[...], w_sim_ref[...], preferred_element_type=jnp.float32)
        + jnp.dot(com_ref[...], w_com_ref[...], preferred_element_type=jnp.float32)
        + b_ref[...]
    )
    l0, l1 = acc[:, 0:1], acc[:, 1:2]
    m0, m1 = acc[:, 2:3], acc[:, 3:4]
    y1, y2 = acc[:, 4:5], acc[:, 5:6]

    # softmax over 2 classes == sigmoid of the logit difference (no XLU reductions).
    g0 = jax.nn.sigmoid(l0 - l1)
    y_pred = g0 * m0 + (1.0 - g0) * m1

    # Single packed store: columns [y_pred, y_pred_1, y_pred_2]
    out_ref[...] = jnp.concatenate([y_pred, y1, y2], axis=-1)


# ----------------------------------------------------------------------------
# Wrapper
# ----------------------------------------------------------------------------
def _round_up(x, m):
    return (x + m - 1) // m * m


def moef_forward(sim, com, params, *, tile_b=512, activation_dtype=None):
    """Fused MoEF forward. Returns (y_pred, y_pred_1, y_pred_2), each (B, 1) f32.

    activation_dtype=jnp.bfloat16 halves HBM traffic for the (memory-bound)
    activation reads; matmul accumulation stays float32.
    """
    B, sim_dim = sim.shape
    _, com_dim = com.shape

    w_sim, w_com, b = params["w_sim"], params["w_com"], params["b"]
    if activation_dtype is not None:
        sim = sim.astype(activation_dtype)
        com = com.astype(activation_dtype)
        w_sim = w_sim.astype(activation_dtype)
        w_com = w_com.astype(activation_dtype)

    n_out = b.shape[-1]  # 8 packed columns
    itemsize = jnp.dtype(sim.dtype).itemsize
    sublane = 16 if itemsize < 4 else 8  # sub-32-bit dtypes pack 2 rows / sublane

    # Tile the batch; pad the ragged remainder (padded rows are sliced off below).
    tile_b = max(sublane, min(tile_b, _round_up(B, sublane)))
    tile_b = _round_up(tile_b, sublane)
    padded_b = _round_up(B, tile_b)
    if padded_b != B:
        sim = jnp.pad(sim, ((0, padded_b - B), (0, 0)))
        com = jnp.pad(com, ((0, padded_b - B), (0, 0)))

    grid = (padded_b // tile_b,)

    bytes_accessed = int(
        padded_b * (sim_dim + com_dim) * itemsize          # activations in
        + (sim_dim + com_dim) * n_out * itemsize + n_out * 4  # weights + bias
        + padded_b * 3 * 4                                   # packed output
    )
    cost = pl.CostEstimate(
        flops=int(2 * padded_b * (sim_dim + com_dim) * n_out + 6 * padded_b),
        transcendentals=int(padded_b),
        bytes_accessed=bytes_accessed,
    )

    out = pl.pallas_call(
        moef_kernel,
        out_shape=jax.ShapeDtypeStruct((padded_b, 3), jnp.float32),
        grid=grid,
        in_specs=[
            pl.BlockSpec((tile_b, sim_dim), lambda i: (i, 0)),
            pl.BlockSpec((tile_b, com_dim), lambda i: (i, 0)),
            pl.BlockSpec((sim_dim, n_out), lambda i: (0, 0)),  # resident across grid
            pl.BlockSpec((com_dim, n_out), lambda i: (0, 0)),
            pl.BlockSpec((1, n_out), lambda i: (0, 0)),
        ],
        out_specs=pl.BlockSpec((tile_b, 3), lambda i: (i, 0)),
        compiler_params=pltpu.CompilerParams(
            dimension_semantics=("parallel",),       # megacore sharding on v7x
            vmem_limit_bytes=32 * 1024 * 1024,
        ),
        cost_estimate=cost,
    )(sim, com, w_sim, w_com, b)

    out = out[:B]
    return out[:, 0:1], out[:, 1:2], out[:, 2:3]


# ----------------------------------------------------------------------------
# Parameters (PyTorch-style init) + packing
# ----------------------------------------------------------------------------
def pack_params(raw, sim_dim, com_dim):
    """Pack gate/MOE/fc1/fc2 into [in_dim, 8] weights and a [1, 8] bias."""
    z_s = jnp.zeros((sim_dim, 1), jnp.float32)
    z_c = jnp.zeros((com_dim, 1), jnp.float32)
    w_sim = jnp.concatenate(
        [raw["wg"][:sim_dim], raw["wm"][:sim_dim], raw["w1"], z_s, z_s, z_s], axis=1)
    w_com = jnp.concatenate(
        [raw["wg"][sim_dim:], raw["wm"][sim_dim:], z_c, raw["w2"], z_c, z_c], axis=1)
    b = jnp.concatenate(
        [raw["bg"], raw["bm"], raw["b1"], raw["b2"], jnp.zeros((2,), jnp.float32)]
    )[None, :]
    return {"w_sim": w_sim, "w_com": w_com, "b": b}


def init_params(key, sim_dim, com_dim):
    """Synthetic params shaped like the PyTorch module (Linear default init)."""
    input_dim = sim_dim + com_dim
    keys = jax.random.split(key, 8)

    def lin(kw, kb, fan_in, fan_out):
        bound = 1.0 / (fan_in ** 0.5)
        w = jax.random.uniform(kw, (fan_in, fan_out), jnp.float32, -bound, bound)
        bias = jax.random.uniform(kb, (fan_out,), jnp.float32, -bound, bound)
        return w, bias

    wg, bg = lin(keys[0], keys[1], input_dim, 2)   # gate Linear(input_dim, 2)
    wm, bm = lin(keys[2], keys[3], input_dim, 2)   # MOE  Linear(input_dim, 2)
    w1, b1 = lin(keys[4], keys[5], sim_dim, 1)     # fc1
    w2, b2 = lin(keys[6], keys[7], com_dim, 1)     # fc2

    raw = dict(wg=wg, bg=bg, wm=wm, bm=bm, w1=w1, b1=b1, w2=w2, b2=b2)
    return pack_params(raw, sim_dim, com_dim), raw


# ----------------------------------------------------------------------------
# Pure-JAX reference (mirrors the PyTorch module exactly)
# ----------------------------------------------------------------------------
def moef_reference(sim, com, raw):
    x = jnp.concatenate([sim, com], axis=-1)
    g = jax.nn.softmax(x @ raw["wg"] + raw["bg"], axis=-1)
    m = x @ raw["wm"] + raw["bm"]
    y_pred = jnp.sum(g * m, axis=-1, keepdims=True)
    y1 = sim @ raw["w1"] + raw["b1"]
    y2 = com @ raw["w2"] + raw["b2"]
    return y_pred, y1, y2


if __name__ == "__main__":
    key = jax.random.PRNGKey(0)
    k_sim, k_com, k_par, k_sim2, k_com2 = jax.random.split(key, 5)

    B, SIM_DIM, COM_DIM = 8, 16, 24
    sim = jax.random.normal(k_sim, (B, SIM_DIM), jnp.float32)
    com = jax.random.normal(k_com, (B, COM_DIM), jnp.float32)
    params, raw = init_params(k_par, SIM_DIM, COM_DIM)

    # --- f32 path, single tile -------------------------------------------
    yp, y1, y2 = moef_forward(sim, com, params)
    jax.block_until_ready((yp, y1, y2))
    rp, r1, r2 = moef_reference(sim, com, raw)
    assert jnp.allclose(yp, rp, atol=1e-5), float(jnp.max(jnp.abs(yp - rp)))
    assert jnp.allclose(y1, r1, atol=1e-5)
    assert jnp.allclose(y2, r2, atol=1e-5)

    # --- multi-tile grid + ragged batch (pad/slice) path ------------------
    B2 = 300
    sim2 = jax.random.normal(k_sim2, (B2, SIM_DIM), jnp.float32)
    com2 = jax.random.normal(k_com2, (B2, COM_DIM), jnp.float32)
    yp2, y12, y22 = moef_forward(sim2, com2, params, tile_b=128)
    jax.block_until_ready((yp2, y12, y22))
    rp2, r12, r22 = moef_reference(sim2, com2, raw)
    assert jnp.allclose(yp2, rp2, atol=1e-5)
    assert jnp.allclose(y12, r12, atol=1e-5)
    assert jnp.allclose(y22, r22, atol=1e-5)

    # --- bf16 activation path (halved HBM traffic), looser tolerance ------
    yp_b, y1_b, y2_b = moef_forward(sim, com, params, activation_dtype=jnp.bfloat16)
    jax.block_until_ready((yp_b, y1_b, y2_b))
    assert jnp.allclose(yp_b, rp, atol=1e-1, rtol=1e-1)
    assert jnp.allclose(y1_b, r1, atol=1e-1, rtol=1e-1)
    assert jnp.allclose(y2_b, r2, atol=1e-1, rtol=1e-1)

    print("KERNEL_OK")
</pallas_src>

<mosaic_0001>
module attributes {stable_mosaic.version = 11 : i64} {
  func.func @moef_kernel(%arg0: i32, %arg1: memref<8x16xf32, #tpu.memory_space<vmem>>, %arg2: memref<8x24xf32, #tpu.memory_space<vmem>>, %arg3: memref<16x8xf32, #tpu.memory_space<vmem>>, %arg4: memref<24x8xf32, #tpu.memory_space<vmem>>, %arg5: memref<1x8xf32, #tpu.memory_space<vmem>>, %arg6: memref<8x3xf32, #tpu.memory_space<vmem>>) attributes {dimension_semantics = [#tpu.dimension_semantics<parallel>], iteration_bounds = array<i64: 1>, scalar_prefetch = 0 : i64, scratch_operands = 0 : i64, tpu.core_type = #tpu.core_type<tc>, window_params = [{transform_indices = @transform_0, window_bounds = array<i64: 8, 16>}, {transform_indices = @transform_1, window_bounds = array<i64: 8, 24>}, {pipeline_mode = #tpu.pipeline_mode<synchronous>, transform_indices = @transform_2, window_bounds = array<i64: 16, 8>}, {pipeline_mode = #tpu.pipeline_mode<synchronous>, transform_indices = @transform_3, window_bounds = array<i64: 24, 8>}, {pipeline_mode = #tpu.pipeline_mode<synchronous>, transform_indices = @transform_4, window_bounds = array<i64: 1, 8>}, {transform_indices = @transform_5, window_bounds = array<i64: 8, 3>}]} {
    %c0 = arith.constant 0 : index
    %c0_0 = arith.constant 0 : index
    %0 = vector.load %arg1[%c0, %c0_0] : memref<8x16xf32, #tpu.memory_space<vmem>>, vector<8x16xf32>
    %c0_1 = arith.constant 0 : index
    %c0_2 = arith.constant 0 : index
    %1 = vector.load %arg3[%c0_1, %c0_2] : memref<16x8xf32, #tpu.memory_space<vmem>>, vector<16x8xf32>
    %cst = arith.constant dense<0.000000e+00> : vector<8x8xf32>
    %2 = tpu.matmul %0, %1, %cst {dimension_numbers = #tpu.dot_dimension_numbers<[1], [0], [0], [1], [0, 0, 1, 1], [], []>} : vector<8x16xf32>, vector<16x8xf32>, vector<8x8xf32> -> vector<8x8xf32>
    %c0_3 = arith.constant 0 : index
    %c0_4 = arith.constant 0 : index
    %3 = vector.load %arg2[%c0_3, %c0_4] : memref<8x24xf32, #tpu.memory_space<vmem>>, vector<8x24xf32>
    %c0_5 = arith.constant 0 : index
    %c0_6 = arith.constant 0 : index
    %4 = vector.load %arg4[%c0_5, %c0_6] : memref<24x8xf32, #tpu.memory_space<vmem>>, vector<24x8xf32>
    %cst_7 = arith.constant dense<0.000000e+00> : vector<8x8xf32>
    %5 = tpu.matmul %3, %4, %cst_7 {dimension_numbers = #tpu.dot_dimension_numbers<[1], [0], [0], [1], [0, 0, 1, 1], [], []>} : vector<8x24xf32>, vector<24x8xf32>, vector<8x8xf32> -> vector<8x8xf32>
    %6 = arith.addf %2, %5 : vector<8x8xf32>
    %c0_8 = arith.constant 0 : index
    %c0_9 = arith.constant 0 : index
    %7 = vector.load %arg5[%c0_8, %c0_9] : memref<1x8xf32, #tpu.memory_space<vmem>>, vector<1x8xf32>
    %8 = vector.broadcast %7 : vector<1x8xf32> to vector<8x8xf32>
    %9 = arith.addf %6, %8 : vector<8x8xf32>
    %10 = vector.extract_strided_slice %9 {offsets = [0, 0], sizes = [8, 1], strides = [1, 1]} : vector<8x8xf32> to vector<8x1xf32>
    %11 = vector.extract_strided_slice %9 {offsets = [0, 1], sizes = [8, 1], strides = [1, 1]} : vector<8x8xf32> to vector<8x1xf32>
    %12 = vector.extract_strided_slice %9 {offsets = [0, 2], sizes = [8, 1], strides = [1, 1]} : vector<8x8xf32> to vector<8x1xf32>
    %13 = vector.extract_strided_slice %9 {offsets = [0, 3], sizes = [8, 1], strides = [1, 1]} : vector<8x8xf32> to vector<8x1xf32>
    %14 = vector.extract_strided_slice %9 {offsets = [0, 4], sizes = [8, 1], strides = [1, 1]} : vector<8x8xf32> to vector<8x1xf32>
    %15 = vector.extract_strided_slice %9 {offsets = [0, 5], sizes = [8, 1], strides = [1, 1]} : vector<8x8xf32> to vector<8x1xf32>
    %16 = arith.subf %10, %11 : vector<8x1xf32>
    %17 = arith.negf %16 : vector<8x1xf32>
    %18 = math.exp %17 : vector<8x1xf32>
    %cst_10 = arith.constant 1.000000e+00 : f32
    %19 = vector.broadcast %cst_10 : f32 to vector<8x1xf32>
    %20 = arith.addf %19, %18 : vector<8x1xf32>
    %21 = arith.divf %19, %20 : vector<8x1xf32>
    %22 = arith.mulf %21, %12 : vector<8x1xf32>
    %cst_11 = arith.constant 1.000000e+00 : f32
    %23 = vector.broadcast %cst_11 : f32 to vector<8x1xf32>
    %24 = arith.subf %23, %21 : vector<8x1xf32>
    %25 = arith.mulf %24, %13 : vector<8x1xf32>
    %26 = arith.addf %22, %25 : vector<8x1xf32>
    %27 = tpu.concatenate %26, %14, %15 in 1 : vector<8x1xf32>, vector<8x1xf32>, vector<8x1xf32> -> vector<8x3xf32>
    %c0_12 = arith.constant 0 : index
    %c0_13 = arith.constant 0 : index
    %28 = vector.load %arg6[%c0_12, %c0_13] : memref<8x3xf32, #tpu.memory_space<vmem>>, vector<8x3xf32>
    tpu.vector_store %arg6[%c0_12, %c0_13], %27 {strides = array<i32>} : memref<8x3xf32, #tpu.memory_space<vmem>>, vector<8x3xf32>,
    return
  }
  func.func @transform_0(%arg0: i32) -> (i32, i32) {
    %c0_i32 = arith.constant 0 : i32
    %c0_i32_0 = arith.constant 0 : i32
    return %arg0, %c0_i32 : i32, i32
  }
  func.func @transform_1(%arg0: i32) -> (i32, i32) {
    %c0_i32 = arith.constant 0 : i32
    %c0_i32_0 = arith.constant 0 : i32
    return %arg0, %c0_i32 : i32, i32
  }
  func.func @transform_2(%arg0: i32) -> (i32, i32) {
    %c0_i32 = arith.constant 0 : i32
    %c0_i32_0 = arith.constant 0 : i32
    %c0_i32_1 = arith.constant 0 : i32
    return %c0_i32, %c0_i32_0 : i32, i32
  }
  func.func @transform_3(%arg0: i32) -> (i32, i32) {
    %c0_i32 = arith.constant 0 : i32
    %c0_i32_0 = arith.constant 0 : i32
    %c0_i32_1 = arith.constant 0 : i32
    return %c0_i32, %c0_i32_0 : i32, i32
  }
  func.func @transform_4(%arg0: i32) -> (i32, i32) {
    %c0_i32 = arith.constant 0 : i32
    %c0_i32_0 = arith.constant 0 : i32
    %c0_i32_1 = arith.constant 0 : i32
    return %c0_i32, %c0_i32_0 : i32, i32
  }
  func.func @transform_5(%arg0: i32) -> (i32, i32) {
    %c0_i32 = arith.constant 0 : i32
    %c0_i32_0 = arith.constant 0 : i32
    return %arg0, %c0_i32 : i32, i32
  }
}

</mosaic_0001>

<bundles_post_ra>
// kernel: tpu_custom_call.1
= control target key start
LH: loop header
LB: loop body
LE: loop exit
PB: predicated region body
PF: predicated region fallthrough
CT: control target
= control target key end

     0   :  { %v250_v0 = vmov 0.0   ;;  %vm101_vm0 = vcmask 130048   ;;  %vm251_vm1 = vmmov 0   ;;  %vm27_vm2 = vcmask 195584   ;;  %s253_s7 = smov 127   ;;  %s312_s3 = inlined_call_operand.vmem [shape: f32[24,8], index: 3, kind: input, shape index: {}]   ;;  %s313_s2 = inlined_call_operand.vmem [shape: f32[16,8], index: 2, kind: input, shape index: {}]   ;;  %s314_s0 = inlined_call_operand.vmem [shape: f32[8,16], index: 0, kind: input, shape index: {}]   ;;  %s315_s1 = inlined_call_operand.vmem [shape: f32[8,24], index: 1, kind: input, shape index: {}]   ;;  %s316_s4 = inlined_call_operand.vmem [shape: f32[1,8], index: 4, kind: input, shape index: {}]   ;;  %s317_s5 = inlined_call_operand.vmem [shape: f32[8,3], index: 5, kind: output, shape index: {}]  }
   0x1   :  { %225 = vmatprep.subr.mxu0 %v250_v0  ;;  %234 = vmatprep.subr.mxu1 %v250_v0  ;;  %v26_v1 = vld [vmem:[%s312_s3 + $0x10] sm:$0xff]  ;;  %v22_v2 = vld [vmem:[%s313_s2 + $0x8] sm:$0xff]  ;;  %v21_v4 = vld [vmem:[%s313_s2] sm:$0xff]  ;;  %vm204_vm3 = vcmask 7168   ;;  %vm206_vm4 = vcmask 15360   ;;  %vm208_vm5 = vcmask 23552  }
   0x2   :  { %v25_v3 = vld [vmem:[%s312_s3 + $0x8] sm:$0xff]  ;;  %226 = vmatpush3.msra.mxu0 %v26_v1  ;;  %235 = vmatpush3.msra.mxu1 %v22_v2  ;;  %v20_v5 = vld [vmem:[%s314_s0] sm:$0xff] }
   0x3   :  { %227 = vmatprep.subr.mxu0 %v250_v0  ;;  %236 = vmatprep.subr.mxu1 %v250_v0  ;;  %v24_v6 = vld [vmem:[%s312_s3] sm:$0xff]  ;;  %s252_s3 = smov 125  }
   0x4   :  { %228 = vmatpush3.msra.mxu0 %v25_v3  ;;  %237 = vmatpush3.msra.mxu1 %v21_v4  ;;  %v23_v7 = vld [vmem:[%s315_s1] sm:$0xff]  ;;  %s254_s1 = smov 126  }
   0x5   :  { %238 = vmatprep.mubr.msk.f32.mxu1 %vm251_vm1, %v250_v0  ;;  %229 = vmatprep.subr.mxu0 %v250_v0  ;;  %v216_v10 = vld [vmem:[%s316_s4] ss:$0 sm:$0xff] }
   0x6   :  { %239 = vmatmul.mubr.msk.f32.vlgmr.msra.gmra.mxu1 %vm101_vm0, %v20_v5  ;;  %230 = vmatpush3.msra.mxu0 %v24_v6 }
   0x7   :  { %231 = vmatprep.mubr.msk.f32.mxu0 %vm251_vm1, %v250_v0 }
   0x8   :  { %232 = vmatmul.mubr.msk.f32.vlgmr.msra.gmra.mxu0 %vm27_vm2, %v23_v7 }
  0xc6   :  { %v171_v8 = vpop.f32.mrf.mxu1 }
  0xc8   :  { %v97_v9 = vpop.f32.mrf.mxu0  ;;  %v240_v11 = vpop.f32.mrf.mxu1 }
  0xc9   :  { %v172_v12 = vadd.f32 %v171_v8, %v97_v9 }
  0xca   :  { %v233_v13 = vpop.f32.mrf.mxu0 }
  0xcb   :  { %v182_v14 = vadd.f32 %v216_v10, %v172_v12 }
  0xcd   :  { %199 = vrot.lane.b32.xlu1 %v182_v14, %s252_s3  ;;  %184 = vrot.lane.b32.xlu0 %v182_v14, %s253_s7 }
  0xd1   :  { %194 = vrot.lane.b32.xlu0 %v182_v14, %s254_s1 }
 0x13f   :  { %v185_v15 = vpop.permute.xlu0 %184  ;;  %v200_v22 = vpop.permute.xlu1 %199 }
 0x140   :  { %v187_v16 = vsub.f32 %v182_v14, %v185_v15 }
 0x142   :  { %v217_v17 = vmul.f32 -1.442695, %v187_v16 }
 0x143   :  { %v195_v23 = vpop.permute.xlu0 %194 }
 0x144   :  { %246 = vpow2.f32 %v217_v17 }
 0x151   :  { %v247_v18 = vpop.eup %246 }
 0x152   :  { %v191_v19 = vadd.f32 1.0, %v247_v18 }
 0x154   :  { %248 = vrcp.f32 %v191_v19 }
 0x161   :  { %v249_v20 = vpop.eup %248 }
 0x162   :  { %v198_v21 = vsub.f32 1.0, %v249_v20  ;;  %v197_v25 = vmul.f32 %v249_v20, %v195_v23 }
 0x164   :  { %v202_v24 = vmul.f32 %v200_v22, %v198_v21 }
 0x166   :  { %v203_v26 = vadd.f32 %v202_v24, %v197_v25 }
 0x168   :  { %v205_v27 = vsel %vm204_vm3, %v203_v26, %v200_v22 }
 0x169   :  { %v207_v28 = vsel %vm206_vm4, %v205_v27, %v200_v22 }
 0x16a   :  { %209 = vst.msk [vmem:[%s317_s5] sm:$0xff] %vm208_vm5, %v207_v28 }

</bundles_post_ra>
